<compile_context>
chip_gen: v5e
topology: v5e:2x2
jax: 0.10.0
libtpu: 0.0.40
codegen_flags: <defaults>
</compile_context>

<pallas_src>
import functools

import jax
import jax.numpy as jnp
from jax.experimental import pallas as pl
from jax.experimental.pallas import tpu as pltpu


def fused_predictor_kernel(gates_ref, w_ref, b_ref, out_ref, *, req_start):
    """gates_ref: (2B, 4H), w_ref: (4H, Cpad), b_ref: (1, Cpad), out_ref: (2B, Cpad).

    Single MXU pass for all four heads (block-diagonal weight); sigmoid only on
    columns >= req_start (the request head).  Dropout is identity in eval mode.
    """
    x = gates_ref[...]                                           # (2B, 4H)
    y = jnp.dot(x, w_ref[...], preferred_element_type=jnp.float32) + b_ref[...]
    col = jax.lax.broadcasted_iota(jnp.int32, y.shape, 1)
    y = jnp.where(col >= req_start, jax.nn.sigmoid(y), y)
    out_ref[...] = y.astype(out_ref.dtype)


def _build_fused_params(params):
    """Block-diagonal weight (4H, Cpad) + concatenated bias (1, Cpad), padded to
    a 128-lane-multiple output width so the kernel's store is unmasked."""
    (wf, bf), (wp, bp), (wa, ba), (wr, br) = params
    H = wf.shape[0]
    ws = (wf, wp, wa, wr)
    bs = (bf, bp, ba, br)
    cs = tuple(w.shape[1] for w in ws)
    c_total = sum(cs)
    c_pad = ((c_total + 127) // 128) * 128

    w_blk = jnp.zeros((4 * H, c_pad), jnp.float32)
    b_cat = jnp.zeros((1, c_pad), jnp.float32)
    off = 0
    for i, (w, b, c) in enumerate(zip(ws, bs, cs)):
        w_blk = w_blk.at[i * H:(i + 1) * H, off:off + c].set(w.astype(jnp.float32))
        b_cat = b_cat.at[0, off:off + c].set(b.astype(jnp.float32))
        off += c
    req_start = cs[0] + cs[1] + cs[2]          # first column of the request head
    return w_blk, b_cat, cs, req_start


def predictor_pallas(stacked_gates_2d, w_blk, b_cat, req_start):
    """stacked_gates_2d: (2B, 4H) lane-dense gates.  Returns (2B, Cpad)."""
    rows = stacked_gates_2d.shape[0]
    c_pad = w_blk.shape[1]

    vmem = pl.BlockSpec(memory_space=pltpu.MemorySpace.VMEM)
    fn = pl.pallas_call(
        functools.partial(fused_predictor_kernel, req_start=req_start),
        out_shape=jax.ShapeDtypeStruct((rows, c_pad), jnp.float32),
        in_specs=[vmem, vmem, vmem],
        out_specs=vmem,
    )
    return fn(stacked_gates_2d, w_blk, b_cat)


def dialogue_state_tracker_forward(original_embeddings, embeddings, params):
    """Numeric part of DialogueStateTracker.forward.

    original_embeddings, embeddings: (B, 4, H) pooled PTM outputs.
    Returns the 8-tuple in the same order as the PyTorch module."""
    B, four, H = embeddings.shape
    assert four == 4 and original_embeddings.shape == embeddings.shape

    w_blk, b_cat, (cf, cp, ca, cr), req_start = _build_fused_params(params)

    # Fold the (original, perturbed) pair into the batch and make rows lane-dense.
    gates2d = jnp.concatenate(
        [original_embeddings.reshape(B, 4 * H).astype(jnp.float32),
         embeddings.reshape(B, 4 * H).astype(jnp.float32)],
        axis=0)                                               # (2B, 4H)

    out = predictor_pallas(gates2d, w_blk, b_cat, req_start)  # (2B, Cpad)

    o, p = out[:B], out[B:2 * B]
    s0, s1, s2, s3 = 0, cf, cf + cp, cf + cp + ca
    return (o[:, s0:s1], o[:, s1:s2], o[:, s2:s3], o[:, s3:s3 + cr],   # original_*
            p[:, s0:s1], p[:, s1:s2], p[:, s2:s3], p[:, s3:s3 + cr])   # perturbed


def reference_forward(original_embeddings, embeddings, params):
    (wf, bf), (wp, bp), (wa, ba), (wr, br) = params

    def predictor(g):
        food = g[:, 0, :] @ wf + bf
        price = g[:, 1, :] @ wp + bp
        area = g[:, 2, :] @ wa + ba
        req = jax.nn.sigmoid(g[:, 3, :] @ wr + br)
        return food, price, area, req

    of, op, oa, orq = predictor(original_embeddings)
    f, p, a, r = predictor(embeddings)
    return (of, op, oa, orq, f, p, a, r)


if __name__ == "__main__":
    # Small, deterministic synthetic config
    B = 2            # batch
    H = 32           # hidden_size == embed_size
    FOOD_C = 16      # food_class
    PRICE_C = 8      # price_range_class
    AREA_C = 8       # area_class
    REQ_C = 8        # request_class

    key = jax.random.PRNGKey(0)
    keys = jax.random.split(key, 10)

    # TODO(synk): tokenizer + pretrained transformer produce these embeddings in
    # the real model; synthesized here.
    embeddings = jax.random.normal(keys[0], (B, 4, H), jnp.float32)
    original_embeddings = jax.random.normal(keys[1], (B, 4, H), jnp.float32)

    def make_linear(kw, kb, cin, cout):
        # weights stored (cin, cout) == PyTorch Linear weight transposed
        w = jax.random.normal(kw, (cin, cout), jnp.float32) * 0.05
        b = jax.random.normal(kb, (cout,), jnp.float32) * 0.05
        return w, b

    params = (
        make_linear(keys[2], keys[3], H, FOOD_C),
        make_linear(keys[4], keys[5], H, PRICE_C),
        make_linear(keys[6], keys[7], H, AREA_C),
        make_linear(keys[8], keys[9], H, REQ_C),
    )

    outs = dialogue_state_tracker_forward(original_embeddings, embeddings, params)
    outs = jax.block_until_ready(outs)

    refs = reference_forward(original_embeddings, embeddings, params)
    for o, r in zip(outs, refs):
        assert o.shape == r.shape and o.dtype == r.dtype
        assert jnp.allclose(o, r, atol=1e-5, rtol=1e-5)

    print("KERNEL_OK")
</pallas_src>

<mosaic_0001>
module attributes {stable_mosaic.version = 11 : i64} {
  func.func @fused_predictor_kernel(%arg0: memref<4x128xf32, #tpu.memory_space<vmem>>, %arg1: memref<128x128xf32, #tpu.memory_space<vmem>>, %arg2: memref<1x128xf32, #tpu.memory_space<vmem>>, %arg3: memref<4x128xf32, #tpu.memory_space<vmem>>) attributes {dimension_semantics = [], scalar_prefetch = 0 : i64, scratch_operands = 0 : i64, tpu.core_type = #tpu.core_type<tc>} {
    %c0 = arith.constant 0 : index
    %c0_0 = arith.constant 0 : index
    %0 = vector.load %arg0[%c0, %c0_0] : memref<4x128xf32, #tpu.memory_space<vmem>>, vector<4x128xf32>
    %c0_1 = arith.constant 0 : index
    %c0_2 = arith.constant 0 : index
    %1 = vector.load %arg1[%c0_1, %c0_2] : memref<128x128xf32, #tpu.memory_space<vmem>>, vector<128x128xf32>
    %cst = arith.constant dense<0.000000e+00> : vector<4x128xf32>
    %2 = tpu.matmul %0, %1, %cst {dimension_numbers = #tpu.dot_dimension_numbers<[1], [0], [0], [1], [0, 0, 1, 1], [], []>} : vector<4x128xf32>, vector<128x128xf32>, vector<4x128xf32> -> vector<4x128xf32>
    %c0_3 = arith.constant 0 : index
    %c0_4 = arith.constant 0 : index
    %3 = vector.load %arg2[%c0_3, %c0_4] : memref<1x128xf32, #tpu.memory_space<vmem>>, vector<1x128xf32>
    %4 = vector.broadcast %3 : vector<1x128xf32> to vector<4x128xf32>
    %5 = arith.addf %2, %4 : vector<4x128xf32>
    %6 = tpu.iota {dimensions = array<i32: 1>} : vector<4x128xi32>
    %c32_i32 = arith.constant 32 : i32
    %7 = vector.broadcast %c32_i32 : i32 to vector<4x128xi32>
    %8 = arith.cmpi sge, %6, %7 : vector<4x128xi32>
    %9 = arith.negf %5 : vector<4x128xf32>
    %10 = math.exp %9 : vector<4x128xf32>
    %cst_5 = arith.constant 1.000000e+00 : f32
    %11 = vector.broadcast %cst_5 : f32 to vector<4x128xf32>
    %12 = arith.addf %11, %10 : vector<4x128xf32>
    %13 = arith.divf %11, %12 : vector<4x128xf32>
    %14 = arith.select %8, %13, %5 : vector<4x128xi1>, vector<4x128xf32>
    %c0_6 = arith.constant 0 : index
    %c0_7 = arith.constant 0 : index
    %15 = vector.load %arg3[%c0_6, %c0_7] : memref<4x128xf32, #tpu.memory_space<vmem>>, vector<4x128xf32>
    tpu.vector_store %arg3[%c0_6, %c0_7], %14 {strides = array<i32>} : memref<4x128xf32, #tpu.memory_space<vmem>>, vector<4x128xf32>,
    return
  }
}

</mosaic_0001>

<bundles_post_ra>
// kernel: tpu_custom_call.1
= control target key start
LH: loop header
LB: loop body
LE: loop exit
PB: predicated region body
PF: predicated region fallthrough
CT: control target
= control target key end

     0   :  { %8 = vsyncpa [#allocation3], 0  ;;  %s254_s0 = inlined_call_operand.hbm [shape: f32[4,128], index: 0, kind: input, shape index: {}]   ;;  %s255_s1 = inlined_call_operand.hbm [shape: f32[128,128], index: 1, kind: input, shape index: {}]   ;;  %s256_s2 = inlined_call_operand.vmem [shape: f32[1,128], index: 2, kind: input, shape index: {}]   ;;  %s257_s3 = inlined_call_operand.hbm [shape: f32[4,128], index: 3, kind: output, shape index: {}]  }
   0x1   :  { %9 = vsyncpa [#allocation6], 0 }
   0x2   :  { %10 = vsyncpa [#allocation4], 0  ;;  %s16_s14 = sshll.u32 %s254_s0, 4  ;;  %s217_s15 = smov [#allocation2]   ;;  %s17_s14 = int_to_ptr.hbm [resolvable:$true] %s16_s14 }
   0x3   :  { %s18_s16 = sshll.u32 %s217_s15, 4  ;;  %s26_s19 = sshll.u32 %s255_s1, 4  ;;  %s19_s16 = int_to_ptr.vmem [resolvable:$true] %s18_s16  ;;  %s27_s19 = int_to_ptr.hbm [resolvable:$true] %s26_s19 }
   0x4   :  { %21 = dma.hbm_to_vmem [thread:$0]  %s17_s14, 64, %s19_s16, [#allocation3]  }
   0x5   :  { %s218_s20 = smov [#allocation5]   ;;  %s219_s22 = smov 128  }
   0x6   :  { %s28_s21 = sshll.u32 %s218_s20, 4  ;;  %s220_s23 = smov 8   ;;  %s29_s21 = int_to_ptr.vmem [resolvable:$true] %s28_s21 }
   0x7   :  { %34 = dma.hbm_to_vmem [thread:$0]  %s27_s19, 2048, %s29_s21, [#allocation6], %s219_s22, %s219_s22, %s220_s23  }
   0x8   :  { %211 = dma.done.wait [#allocation3], 64  }
   0x9   :  { %212 = vsyncadd [#allocation3], 4294967232 }
   0xa   :  { %213 = dma.done.wait [#allocation6], 2048  }
   0xb   :  { %214 = vsyncadd [#allocation6], 4294965248  ;;  %v61_v0 = vld [vmem:[#allocation5 + $0x78] sm:$0xff]  ;;  %v60_v1 = vld [vmem:[#allocation5 + $0x70] sm:$0xff]  ;;  %v86_v24 = vlaneseq  ;;  %s221_s24 = smov [#allocation7]   ;;  %s117_s27 = sshll.u32 %s257_s3, 4  ;;  %s118_s27 = int_to_ptr.hbm [resolvable:$true] %s117_s27 }
   0xc   :  { %66 = vmatpush.msra.mxu0 %v61_v0  ;;  %v59_v2 = vld [vmem:[#allocation5 + $0x68] sm:$0xff]  ;;  %v58_v3 = vld [vmem:[#allocation5 + $0x60] sm:$0xff]  ;;  %v57_v4 = vld [vmem:[#allocation5 + $0x58] sm:$0xff] }
   0xd   :  { %v56_v5 = vld [vmem:[#allocation5 + $0x50] sm:$0xff]  ;;  %v55_v6 = vld [vmem:[#allocation5 + $0x48] sm:$0xff]  ;;  %v54_v7 = vld [vmem:[#allocation5 + $0x40] sm:$0xff]  ;;  %v87_v27 = vand.u32 127, %v86_v24 }
   0xe   :  { %67 = vmatpush.msra.mxu0 %v60_v1  ;;  %v53_v8 = vld [vmem:[#allocation5 + $0x38] sm:$0xff]  ;;  %v52_v9 = vld [vmem:[#allocation5 + $0x30] sm:$0xff]  ;;  %v51_v10 = vld [vmem:[#allocation5 + $0x28] sm:$0xff] }
   0xf   :  { %v50_v11 = vld [vmem:[#allocation5 + $0x20] sm:$0xff]  ;;  %v49_v12 = vld [vmem:[#allocation5 + $0x18] sm:$0xff]  ;;  %v48_v13 = vld [vmem:[#allocation5 + $0x10] sm:$0xff]  ;;  %vm88_vm2 = vcmp.ge.s32.totalorder %v87_v27, 32 }
  0x10   :  { %68 = vmatpush.msra.mxu0 %v59_v2  ;;  %v47_v14 = vld [vmem:[#allocation5 + $0x8] sm:$0xff]  ;;  %v46_v15 = vld [vmem:[#allocation5] sm:$0xff]  ;;  %v45_v16 = vld [vmem:[#allocation2] sm:$0xf] }
  0x11   :  { %v134_v17 = vld [vmem:[%s256_s2] ss:$0 sm:$0xff]  ;;  %s115_s2 = sshll.u32 %s221_s24, 4  ;;  %s116_s2 = int_to_ptr.vmem [resolvable:$true] %s115_s2 }
  0x12   :  { %69 = vmatpush.msra.mxu0 %v58_v3 }
  0x14   :  { %70 = vmatpush.msra.mxu0 %v57_v4 }
  0x16   :  { %71 = vmatpush.msra.mxu0 %v56_v5 }
  0x18   :  { %72 = vmatpush.msra.mxu0 %v55_v6 }
  0x1a   :  { %73 = vmatpush.msra.mxu0 %v54_v7 }
  0x1c   :  { %74 = vmatpush.msra.mxu0 %v53_v8 }
  0x1e   :  { %75 = vmatpush.msra.mxu0 %v52_v9 }
  0x20   :  { %76 = vmatpush.msra.mxu0 %v51_v10 }
  0x22   :  { %77 = vmatpush.msra.mxu0 %v50_v11 }
  0x24   :  { %78 = vmatpush.msra.mxu0 %v49_v12 }
  0x26   :  { %79 = vmatpush.msra.mxu0 %v48_v13 }
  0x28   :  { %80 = vmatpush.msra.mxu0 %v47_v14 }
  0x2a   :  { %81 = vmatpush.msra.mxu0 %v46_v15 }
  0x2b   :  { %82 = vmatmul.f32.vlgmr.msra.gmra.mxu0 %v45_v16 }
  0xa8   :  { %v83_v18 = vpop.f32.mrf.mxu0 }
  0xa9   :  { %v84_v19 = vadd.f32 %v134_v17, %v83_v18 }
  0xab   :  { %v128_v20 = vmul.f32 -1.442695, %v84_v19 }
  0xad   :  { %135 = vpow2.f32 %v128_v20 }
  0xb3   :  { %v136_v21 = vpop.eup %135 }
  0xb4   :  { %v92_v22 = vadd.f32 1.0, %v136_v21 }
  0xb6   :  { %137 = vrcp.f32 %v92_v22  ;;  %v104_v28 = vand.u32 2147483648, %v92_v22  ;;  %v102_v30 = vand.u32 2147483647, %v92_v22  ;;  %vm98_vm1 = vweird.f32 %v92_v22 }
  0xb8   :  { %v105_v32 = vor.u32 1.1754944e-38, %v104_v28  ;;  %vm103_vm4 = vcmp.eq.f32.partialorder %v102_v30, 8.507059e+37 }
  0xbc   :  { %v138_v23 = vpop.eup %137 }
  0xbd   :  { %v94_v25 = vmul.f32 %v138_v23, %v92_v22  ;;  %vm99_vm0 = vweird.f32 %v138_v23 }
  0xbe   :  { %vm100_vm3 = vmor %vm98_vm1, %vm99_vm0 }
  0xbf   :  { %v95_v26 = vsub.f32 1.0, %v94_v25 }
  0xc1   :  { %v96_v29 = vmul.f32 %v138_v23, %v95_v26 }
  0xc3   :  { %v97_v31 = vadd.f32 %v138_v23, %v96_v29 }
  0xc5   :  { %v101_v33 = vsel %vm100_vm3, %v138_v23, %v97_v31 }
  0xc6   :  { %v106_v34 = vsel %vm103_vm4, %v105_v32, %v101_v33 }
  0xc7   :  { %v108_v35 = vsel %vm88_vm2, %v106_v34, %v84_v19 }
  0xc8   :  { %109 = vst [vmem:[#allocation7] sm:$0xf] %v108_v35 }
  0xc9   :  { %120 = dma.vmem_to_hbm [thread:$0]  %s116_s2, 64, %s118_s27, [#allocation4]  }
  0xca   :  { %215 = dma.done.wait [#allocation4], 64  }
  0xcb   :  { %216 = vsyncadd [#allocation4], 4294967232 }
  0xcc   :  { %125 = vsyncpa [#allocation3], 1 }
  0xcd   :  { %126 = vsyncpa [#allocation6], 1 }
  0xce   :  { %127 = vsyncpa [#allocation4], 1 }

</bundles_post_ra>
